<compile_context>
chip_gen: v6e
topology: v6e:2x2x1
jax: 0.10.0
libtpu: 0.0.40
codegen_flags: <defaults>
</compile_context>

<pallas_src>
import jax
import jax.numpy as jnp
from jax.experimental import pallas as pl
from jax.experimental.pallas import tpu as pltpu


def _round_up(n, m):
    return ((n + m - 1) // m) * m


# --------------------------------------------------------------------------
# Kernels
# --------------------------------------------------------------------------
def dae_kernel_fused(x_ref, w0_ref, b0_ref, wld_ref, bld_ref,
                     wd1_ref, bd1_ref, out_ref):
    # x arrives f32; cast to bf16 here (cheap VPU work hidden under the MXU).
    x = x_ref[...].astype(jnp.bfloat16)
    # encoder: Linear -> Tanh (f32 accumulate + f32 epilogue; tanh uses the
    # otherwise-idle EUP slot).
    h = jnp.tanh(
        jnp.dot(x, w0_ref[...], preferred_element_type=jnp.float32) + b0_ref[...]
    ).astype(jnp.bfloat16)
    # latent Linear and decoder Linear[0] folded offline into one
    # [hidden, hidden] matmul (W_lat @ W_dec0) — fills a 256-class MXU.
    d = (jnp.dot(h, wld_ref[...], preferred_element_type=jnp.float32)
         + bld_ref[...]).astype(jnp.bfloat16)
    # decoder Linear[1] (no activation).
    out_ref[...] = (
        jnp.dot(d, wd1_ref[...], preferred_element_type=jnp.float32) + bd1_ref[...]
    ).astype(out_ref.dtype)


def dae_kernel(x_ref, w0_ref, b0_ref, wl_ref, bl_ref,
               wd0_ref, bd0_ref, wd1_ref, bd1_ref, out_ref):
    # Unfused path (used when latent < hidden/2, where fusing would add FLOPs).
    x = x_ref[...].astype(jnp.bfloat16)
    h = jnp.tanh(
        jnp.dot(x, w0_ref[...], preferred_element_type=jnp.float32) + b0_ref[...]
    ).astype(jnp.bfloat16)
    z = (jnp.dot(h, wl_ref[...], preferred_element_type=jnp.float32)
         + bl_ref[...]).astype(jnp.bfloat16)
    d = (jnp.dot(z, wd0_ref[...], preferred_element_type=jnp.float32)
         + bd0_ref[...]).astype(jnp.bfloat16)
    out_ref[...] = (
        jnp.dot(d, wd1_ref[...], preferred_element_type=jnp.float32) + bd1_ref[...]
    ).astype(out_ref.dtype)


# --------------------------------------------------------------------------
# One-time parameter preparation (model-load time, NOT per forward)
# --------------------------------------------------------------------------
def prepare_params(params):
    """bf16-cast weights once (halves resident HBM + per-call DMA traffic) and,
    when it does not increase FLOPs (hidden <= 2*latent), fold the latent and
    decoder[0] Linears into a single [hidden, hidden] weight (fusion done in
    f32, then cast to bf16)."""
    hidden = params["w_enc0"].shape[1]
    latent = params["w_lat"].shape[1]
    fuse = hidden <= 2 * latent
    prepped = {
        "fused": fuse,
        "w_enc0": params["w_enc0"].astype(jnp.bfloat16),
        "b_enc0": params["b_enc0"].astype(jnp.float32),
        "w_dec1": params["w_dec1"].astype(jnp.bfloat16),
        "b_dec1": params["b_dec1"].astype(jnp.float32),
    }
    if fuse:
        w_lat = params["w_lat"].astype(jnp.float32)
        w_dec0 = params["w_dec0"].astype(jnp.float32)
        prepped["w_latdec0"] = (w_lat @ w_dec0).astype(jnp.bfloat16)
        prepped["b_latdec0"] = (params["b_lat"].astype(jnp.float32) @ w_dec0
                                + params["b_dec0"].astype(jnp.float32))
    else:
        prepped["w_lat"] = params["w_lat"].astype(jnp.bfloat16)
        prepped["b_lat"] = params["b_lat"].astype(jnp.float32)
        prepped["w_dec0"] = params["w_dec0"].astype(jnp.bfloat16)
        prepped["b_dec0"] = params["b_dec0"].astype(jnp.float32)
    return prepped


# --------------------------------------------------------------------------
# Wrapper
# --------------------------------------------------------------------------
def _default_batch_tile_cap():
    # v5-class (and older) MXUs are 128-wide, so M=128 loses nothing on matmul
    # throughput while halving f32 intermediates / vector-store pressure.
    # v6e / v7x have 256-class MXUs -> allow 256.
    try:
        kind = jax.devices()[0].device_kind.lower()
    except Exception:
        return 256
    for tag in ("v2", "v3", "v4", "v5"):
        if tag in kind:
            return 128
    return 256


def _select_batch_tile(B, cap):
    # >= 2 grid steps (so ("parallel",) can shard across v7x's two TensorCores
    # and the pipeline has something to overlap), 16-aligned for clean bf16
    # sublane packing of the in-kernel intermediates, never larger than needed.
    bt = _round_up(max(-(-B // 2), 16), 16)       # ceil(B/2) rounded up to 16
    bt = min(bt, cap, _round_up(B, 8))
    return max(bt, 8)


def _vmem_limit_bytes(bt, num_items, hidden, latent, fused):
    x_blk = 2 * bt * num_items * 4                # f32 input block, double-buffered
    out_blk = 2 * bt * num_items * 4              # f32 output block, double-buffered
    if fused:
        w = 2 * (num_items * hidden + hidden * hidden + hidden * num_items)
        b = 4 * (2 * hidden + num_items)
    else:
        w = 2 * (num_items * hidden + hidden * latent
                 + latent * hidden + hidden * num_items)
        b = 4 * (2 * hidden + latent + num_items)
    interm = bt * (2 * hidden + latent + num_items) * 6   # bf16 temps + f32 accums
    need = x_blk + out_blk + w + b + interm
    # ~50% headroom, sensible floor, capped below physical VMEM on all parts.
    return int(min(max(need * 3 // 2, 32 * 1024 * 1024), 96 * 1024 * 1024))


def dae_forward(x, prepped, *, batch_tile=None, out_dtype=jnp.float32):
    """x: [B, num_items] f32.  prepped: output of prepare_params (called once).
    out_dtype=jnp.bfloat16 halves output HBM traffic if the consumer allows it."""
    B, num_items = x.shape
    hidden = prepped["w_enc0"].shape[1]
    fused = prepped["fused"]
    latent = hidden if fused else prepped["w_lat"].shape[1]

    cap = batch_tile if batch_tile is not None else _default_batch_tile_cap()
    bt = _select_batch_tile(B, cap)
    grid = (pl.cdiv(B, bt),)                      # ragged last block; no pad copy

    # Batch-tiled f32 input / output blocks (lane dim = num_items, 128-aligned
    # or full-extent).  Padded rows of the last block carry garbage but rows
    # are independent through the matmul chain and their writes are masked.
    x_spec = pl.BlockSpec((bt, num_items), lambda i: (i, 0))
    out_spec = pl.BlockSpec((bt, num_items), lambda i: (i, 0))
    # Weights / biases: whole array resident in VMEM, single copy for the
    # entire call (constant across the grid -> no double buffering needed).
    vmem = pl.BlockSpec(memory_space=pltpu.MemorySpace.VMEM)

    if fused:
        kernel = dae_kernel_fused
        weight_args = (prepped["w_enc0"], prepped["b_enc0"],
                       prepped["w_latdec0"], prepped["b_latdec0"],
                       prepped["w_dec1"], prepped["b_dec1"])
        flops = 2 * B * (num_items * hidden + hidden * hidden + hidden * num_items)
    else:
        kernel = dae_kernel
        weight_args = (prepped["w_enc0"], prepped["b_enc0"],
                       prepped["w_lat"], prepped["b_lat"],
                       prepped["w_dec0"], prepped["b_dec0"],
                       prepped["w_dec1"], prepped["b_dec1"])
        flops = 2 * B * (num_items * hidden + hidden * latent
                         + latent * hidden + hidden * num_items)

    weight_bytes = sum(int(a.size) * a.dtype.itemsize for a in weight_args)
    bytes_accessed = (B * num_items * 4                       # read x (f32)
                      + B * num_items * jnp.dtype(out_dtype).itemsize
                      + weight_bytes)

    call = pl.pallas_call(
        kernel,
        out_shape=jax.ShapeDtypeStruct((B, num_items), out_dtype),
        grid=grid,
        in_specs=[x_spec] + [vmem] * len(weight_args),
        out_specs=out_spec,
        compiler_params=pltpu.CompilerParams(
            dimension_semantics=("parallel",),
            vmem_limit_bytes=_vmem_limit_bytes(bt, num_items, hidden, latent, fused),
        ),
        cost_estimate=pl.CostEstimate(
            flops=int(flops),
            transcendentals=int(B * hidden),     # tanh
            bytes_accessed=int(bytes_accessed)),
    )
    return call(x, *weight_args)


# --------------------------------------------------------------------------
# Params / references
# --------------------------------------------------------------------------
def xavier_uniform(key, fan_in, fan_out):
    # matches nn.init.xavier_uniform_ on an (out, in) weight; stored as (in, out).
    limit = jnp.sqrt(6.0 / (fan_in + fan_out))
    return jax.random.uniform(key, (fan_in, fan_out), jnp.float32,
                              minval=-limit, maxval=limit)


def init_params(key, num_items, hidden, latent):
    keys = jax.random.split(key, 8)
    return {
        "w_enc0": xavier_uniform(keys[0], num_items, hidden),
        "b_enc0": jax.random.uniform(keys[1], (1, hidden), jnp.float32),
        "w_lat":  xavier_uniform(keys[2], hidden, latent),
        "b_lat":  jax.random.uniform(keys[3], (1, latent), jnp.float32),
        "w_dec0": xavier_uniform(keys[4], latent, hidden),
        "b_dec0": jax.random.uniform(keys[5], (1, hidden), jnp.float32),
        "w_dec1": xavier_uniform(keys[6], hidden, num_items),
        "b_dec1": jax.random.uniform(keys[7], (1, num_items), jnp.float32),
    }


def dae_reference_f32(x, p):
    h = jnp.tanh(x @ p["w_enc0"] + p["b_enc0"])
    z = h @ p["w_lat"] + p["b_lat"]
    d = z @ p["w_dec0"] + p["b_dec0"]
    return d @ p["w_dec1"] + p["b_dec1"]


def dae_reference_mixed(x, prepped):
    """Same bf16-operand / f32-accumulate recipe (and fusion) as the kernel."""
    def dot(a, b):
        return jnp.dot(a.astype(jnp.bfloat16), b, preferred_element_type=jnp.float32)
    h = jnp.tanh(dot(x, prepped["w_enc0"]) + prepped["b_enc0"])
    if prepped["fused"]:
        d = dot(h, prepped["w_latdec0"]) + prepped["b_latdec0"]
    else:
        z = dot(h, prepped["w_lat"]) + prepped["b_lat"]
        d = dot(z, prepped["w_dec0"]) + prepped["b_dec0"]
    return dot(d, prepped["w_dec1"]) + prepped["b_dec1"]


# --------------------------------------------------------------------------
# Demo / self-test
# --------------------------------------------------------------------------
if __name__ == "__main__":
    # DAE(num_items=256, latent_dim=128, hidden_layers=[256]) — eval forward.
    # B=200 is not a multiple of the tile: exercises the ragged cdiv-grid path
    # (2 grid steps, partial last block, no wrapper-side pad/cast of x).
    B, NUM_ITEMS, HIDDEN, LATENT = 200, 256, 256, 128

    root = jax.random.PRNGKey(0)
    k_x, k_p = jax.random.split(root)
    x = jax.random.normal(k_x, (B, NUM_ITEMS), jnp.float32)
    params = init_params(k_p, NUM_ITEMS, HIDDEN, LATENT)

    # One-time prep (bf16 weights + latent/decoder0 fusion since hidden <= 2*latent).
    prepped = jax.tree_util.tree_map(
        lambda a: a, prepare_params(params))
    assert prepped["fused"]

    out = dae_forward(x, prepped)
    out = jax.block_until_ready(out)
    assert out.shape == (B, NUM_ITEMS)
    assert out.dtype == jnp.float32

    # Tight check against a reference using the same mixed-precision recipe.
    ref_mp = dae_reference_mixed(x, prepped)
    assert jnp.allclose(out, ref_mp, atol=3e-3, rtol=3e-3), \
        float(jnp.max(jnp.abs(out - ref_mp)))

    # Loose check against the pure-f32 PyTorch-equivalent reference
    # (difference is only the bf16 matmul-operand cast + offline fusion).
    ref_f32 = dae_reference_f32(x, params)
    assert jnp.allclose(out, ref_f32, atol=1.5e-1, rtol=1.5e-1), \
        float(jnp.max(jnp.abs(out - ref_f32)))

    print("KERNEL_OK")
</pallas_src>

<mosaic_0001>
module attributes {stable_mosaic.version = 11 : i64} {
  func.func @dae_kernel_fused(%arg0: i32, %arg1: memref<112x256xf32, #tpu.memory_space<vmem>>, %arg2: memref<256x256xbf16, #tpu.memory_space<vmem>>, %arg3: memref<1x256xf32, #tpu.memory_space<vmem>>, %arg4: memref<256x256xbf16, #tpu.memory_space<vmem>>, %arg5: memref<1x256xf32, #tpu.memory_space<vmem>>, %arg6: memref<256x256xbf16, #tpu.memory_space<vmem>>, %arg7: memref<1x256xf32, #tpu.memory_space<vmem>>, %arg8: memref<112x256xf32, #tpu.memory_space<vmem>>) attributes {dimension_semantics = [#tpu.dimension_semantics<parallel>], iteration_bounds = array<i64: 2>, scalar_prefetch = 0 : i64, scratch_operands = 0 : i64, tpu.core_type = #tpu.core_type<tc>, window_params = [{transform_indices = @transform_0, window_bounds = array<i64: 112, 256>}, {pipeline_mode = #tpu.pipeline_mode<synchronous>, transform_indices = @transform_1, window_bounds = array<i64: 256, 256>}, {pipeline_mode = #tpu.pipeline_mode<synchronous>, transform_indices = @transform_2, window_bounds = array<i64: 1, 256>}, {pipeline_mode = #tpu.pipeline_mode<synchronous>, transform_indices = @transform_3, window_bounds = array<i64: 256, 256>}, {pipeline_mode = #tpu.pipeline_mode<synchronous>, transform_indices = @transform_4, window_bounds = array<i64: 1, 256>}, {pipeline_mode = #tpu.pipeline_mode<synchronous>, transform_indices = @transform_5, window_bounds = array<i64: 256, 256>}, {pipeline_mode = #tpu.pipeline_mode<synchronous>, transform_indices = @transform_6, window_bounds = array<i64: 1, 256>}, {transform_indices = @transform_7, window_bounds = array<i64: 112, 256>}]} {
    %c0 = arith.constant 0 : index
    %c0_0 = arith.constant 0 : index
    %0 = vector.load %arg1[%c0, %c0_0] : memref<112x256xf32, #tpu.memory_space<vmem>>, vector<112x256xf32>
    %1 = arith.truncf %0 : vector<112x256xf32> to vector<112x256xbf16>
    %c0_1 = arith.constant 0 : index
    %c0_2 = arith.constant 0 : index
    %2 = vector.load %arg2[%c0_1, %c0_2] : memref<256x256xbf16, #tpu.memory_space<vmem>>, vector<256x256xbf16>
    %cst = arith.constant dense<0.000000e+00> : vector<112x256xf32>
    %3 = tpu.matmul %1, %2, %cst {dimension_numbers = #tpu.dot_dimension_numbers<[1], [0], [0], [1], [0, 0, 1, 1], [], []>} : vector<112x256xbf16>, vector<256x256xbf16>, vector<112x256xf32> -> vector<112x256xf32>
    %c0_3 = arith.constant 0 : index
    %c0_4 = arith.constant 0 : index
    %4 = vector.load %arg3[%c0_3, %c0_4] : memref<1x256xf32, #tpu.memory_space<vmem>>, vector<1x256xf32>
    %5 = vector.broadcast %4 : vector<1x256xf32> to vector<112x256xf32>
    %6 = arith.addf %3, %5 : vector<112x256xf32>
    %7 = math.tanh %6 : vector<112x256xf32>
    %8 = arith.truncf %7 : vector<112x256xf32> to vector<112x256xbf16>
    %c0_5 = arith.constant 0 : index
    %c0_6 = arith.constant 0 : index
    %9 = vector.load %arg4[%c0_5, %c0_6] : memref<256x256xbf16, #tpu.memory_space<vmem>>, vector<256x256xbf16>
    %cst_7 = arith.constant dense<0.000000e+00> : vector<112x256xf32>
    %10 = tpu.matmul %8, %9, %cst_7 {dimension_numbers = #tpu.dot_dimension_numbers<[1], [0], [0], [1], [0, 0, 1, 1], [], []>} : vector<112x256xbf16>, vector<256x256xbf16>, vector<112x256xf32> -> vector<112x256xf32>
    %c0_8 = arith.constant 0 : index
    %c0_9 = arith.constant 0 : index
    %11 = vector.load %arg5[%c0_8, %c0_9] : memref<1x256xf32, #tpu.memory_space<vmem>>, vector<1x256xf32>
    %12 = vector.broadcast %11 : vector<1x256xf32> to vector<112x256xf32>
    %13 = arith.addf %10, %12 : vector<112x256xf32>
    %14 = arith.truncf %13 : vector<112x256xf32> to vector<112x256xbf16>
    %c0_10 = arith.constant 0 : index
    %c0_11 = arith.constant 0 : index
    %15 = vector.load %arg6[%c0_10, %c0_11] : memref<256x256xbf16, #tpu.memory_space<vmem>>, vector<256x256xbf16>
    %cst_12 = arith.constant dense<0.000000e+00> : vector<112x256xf32>
    %16 = tpu.matmul %14, %15, %cst_12 {dimension_numbers = #tpu.dot_dimension_numbers<[1], [0], [0], [1], [0, 0, 1, 1], [], []>} : vector<112x256xbf16>, vector<256x256xbf16>, vector<112x256xf32> -> vector<112x256xf32>
    %c0_13 = arith.constant 0 : index
    %c0_14 = arith.constant 0 : index
    %17 = vector.load %arg7[%c0_13, %c0_14] : memref<1x256xf32, #tpu.memory_space<vmem>>, vector<1x256xf32>
    %18 = vector.broadcast %17 : vector<1x256xf32> to vector<112x256xf32>
    %19 = arith.addf %16, %18 : vector<112x256xf32>
    %c0_15 = arith.constant 0 : index
    %c0_16 = arith.constant 0 : index
    %20 = vector.load %arg8[%c0_15, %c0_16] : memref<112x256xf32, #tpu.memory_space<vmem>>, vector<112x256xf32>
    tpu.vector_store %arg8[%c0_15, %c0_16], %19 {strides = array<i32>} : memref<112x256xf32, #tpu.memory_space<vmem>>, vector<112x256xf32>,
    return
  }
  func.func @transform_0(%arg0: i32) -> (i32, i32) {
    %c0_i32 = arith.constant 0 : i32
    %c0_i32_0 = arith.constant 0 : i32
    return %arg0, %c0_i32 : i32, i32
  }
  func.func @transform_1(%arg0: i32) -> (i32, i32) {
    %c0_i32 = arith.constant 0 : i32
    %c0_i32_0 = arith.constant 0 : i32
    %c0_i32_1 = arith.constant 0 : i32
    return %c0_i32, %c0_i32_0 : i32, i32
  }
  func.func @transform_2(%arg0: i32) -> (i32, i32) {
    %c0_i32 = arith.constant 0 : i32
    %c0_i32_0 = arith.constant 0 : i32
    %c0_i32_1 = arith.constant 0 : i32
    return %c0_i32, %c0_i32_0 : i32, i32
  }
  func.func @transform_3(%arg0: i32) -> (i32, i32) {
    %c0_i32 = arith.constant 0 : i32
    %c0_i32_0 = arith.constant 0 : i32
    %c0_i32_1 = arith.constant 0 : i32
    return %c0_i32, %c0_i32_0 : i32, i32
  }
  func.func @transform_4(%arg0: i32) -> (i32, i32) {
    %c0_i32 = arith.constant 0 : i32
    %c0_i32_0 = arith.constant 0 : i32
    %c0_i32_1 = arith.constant 0 : i32
    return %c0_i32, %c0_i32_0 : i32, i32
  }
  func.func @transform_5(%arg0: i32) -> (i32, i32) {
    %c0_i32 = arith.constant 0 : i32
    %c0_i32_0 = arith.constant 0 : i32
    %c0_i32_1 = arith.constant 0 : i32
    return %c0_i32, %c0_i32_0 : i32, i32
  }
  func.func @transform_6(%arg0: i32) -> (i32, i32) {
    %c0_i32 = arith.constant 0 : i32
    %c0_i32_0 = arith.constant 0 : i32
    %c0_i32_1 = arith.constant 0 : i32
    return %c0_i32, %c0_i32_0 : i32, i32
  }
  func.func @transform_7(%arg0: i32) -> (i32, i32) {
    %c0_i32 = arith.constant 0 : i32
    %c0_i32_0 = arith.constant 0 : i32
    return %arg0, %c0_i32 : i32, i32
  }
}

</mosaic_0001>

<bundles_post_ra>
// kernel: tpu_custom_call.1
= control target key start
LH: loop header
LB: loop body
LE: loop exit
PB: predicated region body
PF: predicated region fallthrough
CT: control target
= control target key end

     0   :  { %s2705_s0 = inlined_call_operand.hbm [shape: f32[200,256], index: 0, kind: input, shape index: {}]   ;;  %s2706_s1 = inlined_call_operand.hbm [shape: bf16[256,256], index: 1, kind: input, shape index: {}]   ;;  %s2707_s2 = inlined_call_operand.vmem [shape: f32[1,256], index: 2, kind: input, shape index: {}]   ;;  %s2708_s3 = inlined_call_operand.hbm [shape: bf16[256,256], index: 3, kind: input, shape index: {}]   ;;  %s2709_s4 = inlined_call_operand.vmem [shape: f32[1,256], index: 4, kind: input, shape index: {}]   ;;  %s2710_s5 = inlined_call_operand.hbm [shape: bf16[256,256], index: 5, kind: input, shape index: {}]   ;;  %s2711_s6 = inlined_call_operand.vmem [shape: f32[1,256], index: 6, kind: input, shape index: {}]   ;;  %s2712_s7 = inlined_call_operand.hbm [shape: f32[200,256], index: 7, kind: output, shape index: {}]  }
   0x1   :  { %2715 = sst [smem:[#allocation15_spill]] %s2706_s1 }
   0x2   :  { %12 = vsyncpa [#allocation3], 0 }
   0x3   :  { %14 = vsyncpa [#allocation3 + $0x1], 0 }
   0x4   :  { %15 = vsyncpa [#allocation6], 0 }
   0x5   :  { %16 = vsyncpa [#allocation9], 0 }
   0x6   :  { %17 = vsyncpa [#allocation4], 0 }
   0x7   :  { %19 = vsyncpa [#allocation4 + $0x1], 0  ;;  %s2201_s24 = smov 0   ;;  %s2203_s25 = smov 0  }
   0x8   :  { %s2205_s26 = smov 0   ;;  %s2207_s27 = smov 0  }
   0x9 LB: > { %s2222_s28 = sadd.s32 4294967295, %s2148_s27   ;;  %s1532_s29 = sadd.s32 4294967294, %s2148_s27   ;;  %s2148_s27 = sphi %s2207_s27, %s2733_s27   ;;  %s2144_s26 = sphi %s2205_s26, %s2732_s26   ;;  %s2140_s25 = sphi %s2203_s25, %s2731_s25   ;;  %s2136_s24 = sphi %s2201_s24, %s2730_s24  }
   0xa   : > { %s2226_s30 = sadd.s32 1, %s2148_s27   ;;  %s32_s8 = sadd.s32 1, %s2144_s26 }
   0xb   : > { %s29_s9 = ssub.s32 %s2148_s27, %s2226_s30  ;;  %p39_p0 = scmp.ne.s32.totalorder %s2144_s26, %s2140_s25 }
   0xc   : > { %p30_p1 = scmp.eq.s32.totalorder %s29_s9, 0  ;;  %p40_p2 = scmp.eq.s32.totalorder %s2148_s27, 0 }
   0xd   : > { %p45_p3 = scmp.ne.s32.totalorder %s2140_s25, %s2136_s24  ;;  %p2713_p4 = scmp.eq.s32.totalorder %s2222_s28, 0 }
   0xe   : > { %s2238_s10 = scalar_select %p30_p1, %s2144_s26, %s32_s8  }
   0xf   : > { %p2240_p5 = por %p40_p2, %p39_p0  ;;  %p2246_p6 = por %p2713_p4, %p45_p3 }
  0x10   : > { %p195_p7 = scmp.eq.s32.totalorder %s2222_s28, 1  ;;  %p201_p8 = scmp.eq.s32.totalorder %s1532_s29, 1 }
  0x11   : > { %s2717_s12 = scalar_select %p2246_p6, 1, 0 }
  0x12   : > { %p1533_p9 = scmp.ge.s32.totalorder %s2148_s27, 1  ;;  %p208_p10 = scmp.lt.s32.totalorder %s2148_s27, 3 }
  0x13   : > { %p2253_p11 = por %p195_p7, %p39_p0  ;;  %p2257_p12 = por %p201_p8, %p45_p3 }
  0x14   : > { %p2261_p13 = pnand %p1533_p9, %p208_p10  ;;  %s2150_s16 = smov [#allocation5]  }
  0x15   : > { %s2718_s13 = scalar_select %p2253_p11, 1, 0 }
  0x16   : > { %s2719_s14 = scalar_select %p2257_p12, 1, 0 }
  0x17   : > { %p1710_p1 = pneg %p2261_p13  ;;  %s220_s17 = sshll.u32 %s2150_s16, 4  ;;  %s221_s17 = int_to_ptr.vmem [resolvable:$true] %s220_s17 }
  0x18   : > { %s2151_s19 = smov [#allocation7]   ;;  %s1983_s21 = scalar_lea.vmem %s221_s17, 4096 }
  0x19   : > { %p2269_p2 = pnand %p1710_p1, %p2713_p4  ;;  %s236_s20 = sshll.u32 %s2151_s19, 4  ;;  %s237_s20 = int_to_ptr.vmem [resolvable:$true] %s236_s20 }
  0x1a   : > { %p1984_p3 = scmp.ne.s32.totalorder %s221_s17, %s1983_s21  ;;  %p1991_p9 = scmp.lt.s32.totalorder %s221_s17, %s221_s17 }
  0x1b   : > { %p1974_p0 = pneg %p2269_p2  ;;  %p1992_p10 = scmp.lt.s32.totalorder %s1983_s21, %s1983_s21 }
  0x1d   : > { %p1986_p7 = pnand %p1984_p3, %p1974_p0  ;;  %p1993_p12 = por %p1992_p10, %p1991_p9 }
  0x1f   : > { %p1987_p8 = pneg %p1986_p7 }
  0x21   : > { %p1994_p1 = pnand %p1993_p12, %p1987_p8 }
  0x23   : > { %1997 = shalt.err (!%p1994_p1)
}
  0x24   : > { %s2152_s22 = smov 128   ;;  %s2153_s23 = smov 8  }
  0x25   : > { %s2722_s1 = sld [smem:[#allocation15_spill]]  ;;  %s2009_s9 = scalar_lea.vmem %s237_s20, 4096 }
  0x26   : > { %p2010_p4 = scmp.ne.s32.totalorder %s237_s20, %s2009_s9  ;;  %p2017_p11 = scmp.lt.s32.totalorder %s237_s20, %s237_s20 }
  0x27   : > { %p2018_p6 = scmp.lt.s32.totalorder %s2009_s9, %s2009_s9 }
  0x28   : > { %p2012_p3 = pnand %p2010_p4, %p1974_p0 }
  0x29   : > { %p2019_p9 = por %p2018_p6, %p2017_p11 }
  0x2a   : > { %p2013_p7 = pneg %p2012_p3 }
  0x2b   : > { %1713 = dma.hbm_to_vmem [thread:$0]  (!%p2269_p2), %s2722_s1, 4096, %s221_s17, [#allocation6], %s2152_s22, %s2152_s22, %s2153_s23  }
  0x2c   : > { %p2020_p12 = pnand %p2019_p9, %p2013_p7 }
  0x2e   : > { %2023 = shalt.err (!%p2020_p12)
}
  0x2f   : > { %1716 = dma.hbm_to_vmem [thread:$0]  (!%p2269_p2), %s2708_s3, 4096, %s237_s20, [#allocation6], %s2152_s22, %s2152_s22, %s2153_s23  }
  0x30   : > { %s2154_s21 = smov [#allocation8]  }
  0x31   : > { %s252_s17 = sshll.u32 %s2154_s21, 4  ;;  %s253_s17 = int_to_ptr.vmem [resolvable:$true] %s252_s17 }
  0x32   : > { %s2035_s29 = scalar_lea.vmem %s253_s17, 4096  ;;  %p2043_p1 = scmp.lt.s32.totalorder %s253_s17, %s253_s17 }
  0x33   : > { %p2036_p8 = scmp.ne.s32.totalorder %s253_s17, %s2035_s29  ;;  %p2044_p6 = scmp.lt.s32.totalorder %s2035_s29, %s2035_s29 }
  0x35   : > { %p2038_p4 = pnand %p2036_p8, %p1974_p0  ;;  %p2045_p11 = por %p2044_p6, %p2043_p1 }
  0x37   : > { %p2039_p10 = pneg %p2038_p4 }
  0x39   : > { %p2046_p3 = pnand %p2045_p11, %p2039_p10 }
  0x3b   : > { %2049 = shalt.err (!%p2046_p3)
}
  0x3c   : > { %1719 = dma.hbm_to_vmem [thread:$0]  (!%p2269_p2), %s2710_s5, 4096, %s253_s17, [#allocation9], %s2152_s22, %s2152_s22, %s2153_s23  }
  0x3d   : > { %p1537_p7 = scmp.ge.s32.totalorder %s2148_s27, 2 }
  0x3f   : > { %265 = sbr.rel (%p1537_p7) target bundleno = 102 (0x66), region = 40 }
  0x44   : > { %268 = sbr.rel (!%p2240_p5) target bundleno = 102 (0x66), region = 44  ;;  %s269_s20 = sand.u32 (%p2240_p5), 1, %s2144_s26  }
  0x45   : > { %s274_s16 = smul.u32 (%p2240_p5), 14, %s2148_s27  ;;  %s2309_s23 = scalar_lea.sflag (%p2240_p5), [#allocation3], %s269_s20 }
  0x46   : > { %s1694_s19 = smul.u32 (%p2240_p5), 224, %s269_s20 }
  0x47   : > { %s275_s21 = ssub.s32 (%p2240_p5), 25, %s274_s16 }
  0x48   : > { %p276_p0 = scmp.lt.s32.totalorder (%p2240_p5), %s275_s21, 14  ;;  %s273_s17 = scalar_lea.vmem (%p2240_p5), [#allocation2], %s1694_s19 }
  0x4a   : > { %s2735_s21 = smov (!%p276_p0, %s275_s21), 14 }
  0x4b   : > { %s2306_s18 = sshll.u32 %s2735_s21, 8 }
  0x4c   : > { %s281_s22 = ssub.s32 3584, %s2306_s18 }
  0x4d   : > { %282 = vsyncadd %s2309_s23, %s281_s22  ;;  %p1540_p5 = scmp.ne.s32.totalorder %s2306_s18, 0  ;;  %s1660_s11 = smul.u32 3584, %s2148_s27 }
  0x4e   : > { %s288_s29 = sshll.u32 %s273_s17, 4  ;;  %s2054_s22 = scalar_lea.hbm %s2705_s0, 6400  ;;  %s2319_s29 = int_to_ptr.vmem [resolvable:$true] %s288_s29 }
  0x4f   : > { %s2317_s16 = scalar_lea.hbm %s2705_s0, %s1660_s11 }
  0x50   : > { %s2050_s20 = scalar_lea.hbm %s2317_s16, %s2306_s18  ;;  %p2055_p8 = scmp.lt.s32.totalorder %s2317_s16, %s2705_s0 }
  0x51   : > { %p2051_p2 = scmp.ne.s32.totalorder %s2317_s16, %s2050_s20  ;;  %p2056_p4 = scmp.lt.s32.totalorder %s2054_s22, %s2050_s20 }
  0x53   : > { %p2052_p9 = pnand %p2051_p2, %p1540_p5  ;;  %p2057_p10 = por %p2056_p4, %p2055_p8 }
  0x55   : > { %p2053_p12 = pneg %p2052_p9 }
  0x57   : > { %p2058_p1 = pnand %p2057_p10, %p2053_p12 }
  0x59   : > { %2061 = shalt.err (!%p2058_p1)
}
  0x5a   : > { %s2062_s11 = scalar_lea.vmem %s2319_s29, %s2306_s18  ;;  %s2155_s8 = smov [#allocation2]  }
  0x5b   : > { %p2063_p6 = scmp.ne.s32.totalorder %s2319_s29, %s2062_s11  ;;  %s2066_s9 = sshll.u32 %s2155_s8, 4  ;;  %s2067_s9 = int_to_ptr.vmem [resolvable:$false] %s2066_s9 }
  0x5c   : > { %s2068_s19 = scalar_lea.vmem %s2067_s9, 7168  ;;  %p2069_p0 = scmp.lt.s32.totalorder %s2319_s29, %s2067_s9 }
  0x5d   : > { %p2064_p11 = pnand %p2063_p6, %p1540_p5  ;;  %p2070_p2 = scmp.lt.s32.totalorder %s2068_s19, %s2062_s11 }
  0x5f   : > { %p2065_p3 = pneg %p2064_p11  ;;  %p2071_p9 = por %p2070_p2, %p2069_p0 }
  0x61   : > { %p2072_p8 = pnand %p2071_p9, %p2065_p3 }
  0x63   : > { %2075 = shalt.err (!%p2072_p8)
}
  0x64   : > { %s2156_s1 = smov 256   ;;  %s2157_s20 = smov 16  }
  0x65   : > { %294 = dma.hbm_to_vmem [thread:$0]  (%p1540_p5), %s2317_s16, %s2306_s18, %s2319_s29, %s2309_s23, %s2156_s1, %s2156_s1, %s2157_s20  }
  0x66 PF: > { %300 = sbr.rel (%p2261_p13) target bundleno = 878 (0x36e), region = 48  ;;  %s2348_s21 = sand.u32 (!%p2261_p13), 1, %s2140_s25  }
  0x67   : > { %s1695_s22 = smul.u32 (!%p2261_p13), 224, %s2348_s21  ;;  %s303_s17 = scalar_lea.sflag (!%p2261_p13), [#allocation3], %s2348_s21 }
  0x68   : > { %p2723_p12 = scmp.ne.s32.totalorder (!%p2261_p13), %s2717_s12, 0 }
  0x69   : > { %s2354_s11 = scalar_lea.vmem (!%p2261_p13), [#allocation2], %s1695_s22 }
  0x6b   : > { %2119 = dma.done.wait (%p2723_p12), %s303_s17, 3584  }
  0x6c   : > { %2121 = vsyncadd (%p2723_p12), %s303_s17, 4294963712  ;;  %p2724_p5 = scmp.eq.s32.totalorder %s2222_s28, 0 }
  0x6e   : > { %2123 = dma.done.wait (%p2724_p5), [#allocation6], 8192   ;;  %p2725_p13 = pmov %p2724_p5 }
  0x6f   : > { %p2726_p4 = pmov %p2724_p5 }
  0x70   : > { %2125 = vsyncadd (%p2725_p13), [#allocation6], 4294959104 }
  0x71   : > { %2127 = dma.done.wait (%p2726_p4), [#allocation9], 4096   ;;  %p2727_p10 = pmov %p2726_p4 }
  0x72   : > { %v1772_v0 = vld [vmem:[#allocation5 + $0x74] ss:$8 sps:$4 sm:$0xff]   ;;  %v1774_v1 = vld [vmem:[#allocation5 + $0x70] ss:$8 sps:$4 sm:$0xff]   ;;  %v1775_v2 = vld [vmem:[#allocation5 + $0x64] ss:$8 sps:$4 sm:$0xff]  }
  0x73   : > { %2129 = vsyncadd (%p2727_p10), [#allocation9], 4294963200  ;;  %607 = vmatprep.subr.bf16.mxu0 %v1772_v0  ;;  %v1777_v3 = vld [vmem:[#allocation5 + $0x60] ss:$8 sps:$4 sm:$0xff]   ;;  %v1778_v4 = vld [vmem:[#allocation5 + $0x54] ss:$8 sps:$4 sm:$0xff]  }
  0x74   : > { %608 = vmatpush1.bf16.msra.mxu0 %v1774_v1  ;;  %v1780_v5 = vld [vmem:[#allocation5 + $0x50] ss:$8 sps:$4 sm:$0xff]   ;;  %v1781_v6 = vld [vmem:[#allocation5 + $0x44] ss:$8 sps:$4 sm:$0xff]   ;;  %v1783_v7 = vld [vmem:[#allocation5 + $0x40] ss:$8 sps:$4 sm:$0xff]  }
  0x75   : > { %609 = vmatprep.subr.bf16.mxu0 %v1775_v2  ;;  %v1784_v8 = vld [vmem:[#allocation5 + $0x34] ss:$8 sps:$4 sm:$0xff]   ;;  %v1786_v9 = vld [vmem:[#allocation5 + $0x30] ss:$8 sps:$4 sm:$0xff]   ;;  %v1787_v10 = vld [vmem:[#allocation5 + $0x24] ss:$8 sps:$4 sm:$0xff]  }
  0x76   : > { %v1789_v11 = vld [vmem:[#allocation5 + $0x20] ss:$8 sps:$4 sm:$0xff]   ;;  %v1790_v12 = vld [vmem:[#allocation5 + $0x14] ss:$8 sps:$4 sm:$0xff]   ;;  %v1792_v16 = vld [vmem:[#allocation5 + $0x10] ss:$8 sps:$4 sm:$0xff]  }
  0x77   : > { %v362_v13 = vld [vmem:[%s2354_s11 + $0x8] sm:$0xff]  ;;  %v364_v14 = vld [vmem:[%s2354_s11 + $0x18] sm:$0xff]  ;;  %v361_v51 = vld [vmem:[%s2354_s11] sm:$0xff]  ;;  %s2586_s8 = scalar_lea.vmem [#allocation10], %s1695_s22  ;;  %s1409_s9 = scalar_lea.sflag [#allocation4], %s2348_s21 }
  0x78   : > { %610 = vmatpush1.bf16.msra.mxu0 %v1777_v3  ;;  %v390_v15 = vpack.c.bf16 %v364_v14, %v362_v13  ;;  %v1793_v17 = vld [vmem:[#allocation5 + $0x4] ss:$8 sps:$4 sm:$0xff]   ;;  %v1795_v18 = vld [vmem:[#allocation5] ss:$8 sps:$4 sm:$0xff]   ;;  %v1796_v19 = vld [vmem:[#allocation5 + $0xf4] ss:$8 sps:$4 sm:$0xff]  }
  0x79   : > { %611 = vmatprep.subr.bf16.mxu0 %v1778_v4  ;;  %v1798_v20 = vld [vmem:[#allocation5 + $0xf0] ss:$8 sps:$4 sm:$0xff]   ;;  %v1799_v21 = vld [vmem:[#allocation5 + $0xe4] ss:$8 sps:$4 sm:$0xff]   ;;  %v1820_v22 = vld [vmem:[#allocation7 + $0x74] ss:$8 sps:$4 sm:$0xff]  }
  0x7a   : > { %639 = vmatprep.mubr.bf16.mxu0 %v390_v15  ;;  %v1822_v23 = vld [vmem:[#allocation7 + $0x70] ss:$8 sps:$4 sm:$0xff]   ;;  %v1823_v24 = vld [vmem:[#allocation7 + $0x64] ss:$8 sps:$4 sm:$0xff]   ;;  %956 = vmatprep.subr.bf16.mxu1 %v1820_v22  ;;  %v1825_v25 = vld [vmem:[#allocation7 + $0x60] ss:$8 sps:$4 sm:$0xff]  }
  0x7b   : > { %957 = vmatpush1.bf16.msra.mxu1 %v1822_v23  ;;  %v1801_v26 = vld [vmem:[#allocation5 + $0xe0] ss:$8 sps:$4 sm:$0xff]   ;;  %v1826_v27 = vld [vmem:[#allocation7 + $0x54] ss:$8 sps:$4 sm:$0xff]   ;;  %v1828_v29 = vld [vmem:[#allocation7 + $0x50] ss:$8 sps:$4 sm:$0xff]  }
  0x7c   : > { %612 = vmatpush1.bf16.msra.mxu0 %v1780_v5  ;;  %958 = vmatprep.subr.bf16.mxu1 %v1823_v24  ;;  %v1802_v28 = vld [vmem:[#allocation5 + $0xd4] ss:$8 sps:$4 sm:$0xff]   ;;  %v1804_v30 = vld [vmem:[#allocation5 + $0xd0] ss:$8 sps:$4 sm:$0xff]   ;;  %v1829_v31 = vld [vmem:[#allocation7 + $0x44] ss:$8 sps:$4 sm:$0xff]  }
  0x7d   : > { %613 = vmatprep.subr.bf16.mxu0 %v1781_v6  ;;  %v1805_v32 = vld [vmem:[#allocation5 + $0xc4] ss:$8 sps:$4 sm:$0xff]   ;;  %v1807_v33 = vld [vmem:[#allocation5 + $0xc0] ss:$8 sps:$4 sm:$0xff]   ;;  %v1808_v35 = vld [vmem:[#allocation5 + $0xb4] ss:$8 sps:$4 sm:$0xff]  }
  0x7e   : > { %v1831_v34 = vld [vmem:[#allocation7 + $0x40] ss:$8 sps:$4 sm:$0xff]   ;;  %v1832_v36 = vld [vmem:[#allocation7 + $0x34] ss:$8 sps:$4 sm:$0xff]   ;;  %v1834_v37 = vld [vmem:[#allocation7 + $0x30] ss:$8 sps:$4 sm:$0xff]  }
  0x7f   : > { %959 = vmatpush1.bf16.msra.mxu1 %v1825_v25  ;;  %v1810_v38 = vld [vmem:[#allocation5 + $0xb0] ss:$8 sps:$4 sm:$0xff]   ;;  %v1835_v39 = vld [vmem:[#allocation7 + $0x24] ss:$8 sps:$4 sm:$0xff]   ;;  %v1837_v41 = vld [vmem:[#allocation7 + $0x20] ss:$8 sps:$4 sm:$0xff]  }
  0x80   : > { %614 = vmatpush1.bf16.msra.mxu0 %v1783_v7  ;;  %960 = vmatprep.subr.bf16.mxu1 %v1826_v27  ;;  %v1811_v40 = vld [vmem:[#allocation5 + $0xa4] ss:$8 sps:$4 sm:$0xff]   ;;  %v1813_v42 = vld [vmem:[#allocation5 + $0xa0] ss:$8 sps:$4 sm:$0xff]   ;;  %v1838_v43 = vld [vmem:[#allocation7 + $0x14] ss:$8 sps:$4 sm:$0xff]  }
  0x81   : > { %615 = vmatprep.subr.bf16.mxu0 %v1784_v8  ;;  %v1814_v44 = vld [vmem:[#allocation5 + $0x94] ss:$8 sps:$4 sm:$0xff]   ;;  %v1840_v45 = vld [vmem:[#allocation7 + $0x10] ss:$8 sps:$4 sm:$0xff]   ;;  %v1841_v47 = vld [vmem:[#allocation7 + $0x4] ss:$8 sps:$4 sm:$0xff]  }
  0x82   : > { %v1816_v46 = vld [vmem:[#allocation5 + $0x90] ss:$8 sps:$4 sm:$0xff]   ;;  %v1817_v48 = vld [vmem:[#allocation5 + $0x84] ss:$8 sps:$4 sm:$0xff]   ;;  %v1843_v49 = vld [vmem:[#allocation7] ss:$8 sps:$4 sm:$0xff]  }
  0x83   : > { %961 = vmatpush1.bf16.msra.mxu1 %v1828_v29  ;;  %v1819_v50 = vld [vmem:[#allocation5 + $0x80] ss:$8 sps:$4 sm:$0xff]   ;;  %v363_v52 = vld [vmem:[%s2354_s11 + $0x10] sm:$0xff]  ;;  %v368_v55 = vld [vmem:[%s2354_s11 + $0x38] sm:$0xff]  ;;  %p2728_p1 = scmp.ne.s32.totalorder %s2718_s13, 0 }
  0x84   : > { %616 = vmatpush1.bf16.msra.mxu0 %v1786_v9  ;;  %962 = vmatprep.subr.bf16.mxu1 %v1829_v31  ;;  %v1844_v53 = vld [vmem:[#allocation7 + $0xf4] ss:$8 sps:$4 sm:$0xff]   ;;  %v366_v54 = vld [vmem:[%s2354_s11 + $0x28] sm:$0xff]  ;;  %v389_v56 = vpack.c.bf16 %v363_v52, %v361_v51  ;;  %v1846_v57 = vld [vmem:[#allocation7 + $0xf0] ss:$8 sps:$4 sm:$0xff]   ;;  %s1416_s19 = smul.u32 (%p2728_p1), 14, %s2222_s28 }
  0x85   : > { %617 = vmatprep.subr.bf16.mxu0 %v1787_v10  ;;  %v392_v58 = vpack.c.bf16 %v368_v55, %v366_v54  ;;  %v1847_v59 = vld [vmem:[#allocation7 + $0xe4] ss:$8 sps:$4 sm:$0xff]   ;;  %v1849_v60 = vld [vmem:[#allocation7 + $0xe0] ss:$8 sps:$4 sm:$0xff]   ;;  %v367_v62 = vld [vmem:[%s2354_s11 + $0x30] sm:$0xff] }
  0x86   : > { %v365_v61 = vld [vmem:[%s2354_s11 + $0x20] sm:$0xff]  ;;  %v370_v63 = vld [vmem:[%s2354_s11 + $0x48] sm:$0xff]  ;;  %v372_v0 = vld [vmem:[%s2354_s11 + $0x58] sm:$0xff]  ;;  %s1417_s1 = ssub.s32 (%p2728_p1), 25, %s1416_s19 }
  0x87   : > { %963 = vmatpush1.bf16.msra.mxu1 %v1831_v34  ;;  %v391_v1 = vpack.c.bf16 %v367_v62, %v365_v61  ;;  %v394_v2 = vpack.c.bf16 %v372_v0, %v370_v63  ;;  %v369_v3 = vld [vmem:[%s2354_s11 + $0x40] sm:$0xff]  ;;  %v371_v4 = vld [vmem:[%s2354_s11 + $0x50] sm:$0xff]  ;;  %v374_v5 = vld [vmem:[%s2354_s11 + $0x68] sm:$0xff]  ;;  %p1418_p6 = scmp.lt.s32.totalorder (%p2728_p1), %s1417_s1, 14 }
  0x88   : > { %618 = vmatpush1.bf16.msra.mxu0 %v1789_v11  ;;  %964 = vmatprep.subr.bf16.mxu1 %v1832_v36  ;;  %v376_v6 = vld [vmem:[%s2354_s11 + $0x78] sm:$0xff]  ;;  %v393_v7 = vpack.c.bf16 %v371_v4, %v369_v3  ;;  %v373_v9 = vld [vmem:[%s2354_s11 + $0x60] sm:$0xff]  ;;  %v375_v10 = vld [vmem:[%s2354_s11 + $0x70] sm:$0xff] }
  0x89   : > { %619 = vmatprep.subr.bf16.mxu0 %v1790_v12  ;;  %v396_v8 = vpack.c.bf16 %v376_v6, %v374_v5  ;;  %v378_v11 = vld [vmem:[%s2354_s11 + $0x88] sm:$0xff]  ;;  %v380_v12 = vld [vmem:[%s2354_s11 + $0x98] sm:$0xff]  ;;  %v395_v13 = vpack.c.bf16 %v375_v10, %v373_v9  ;;  %v377_v15 = vld [vmem:[%s2354_s11 + $0x80] sm:$0xff] }
  0x8a   : > { %v398_v14 = vpack.c.bf16 %v380_v12, %v378_v11  ;;  %v383_v22 = vld [vmem:[%s2354_s11 + $0xb0] sm:$0xff]  ;;  %v386_v23 = vld [vmem:[%s2354_s11 + $0xc8] sm:$0xff]  ;;  %v388_v24 = vld [vmem:[%s2354_s11 + $0xd8] sm:$0xff] }
  0x8b   : > { %965 = vmatpush1.bf16.msra.mxu1 %v1834_v37  ;;  %v385_v27 = vld [vmem:[%s2354_s11 + $0xc0] sm:$0xff]  ;;  %v1852_v31 = vld [vmem:[#allocation7 + $0xd0] ss:$8 sps:$4 sm:$0xff]   ;;  %v1856_v34 = vld [vmem:[#allocation7 + $0xb4] ss:$8 sps:$4 sm:$0xff]  }
  0x8c   : > { %620 = vmatpush1.bf16.msra.mxu0 %v1792_v16  ;;  %966 = vmatprep.subr.bf16.mxu1 %v1835_v39  ;;  %v379_v16 = vld [vmem:[%s2354_s11 + $0x90] sm:$0xff]  ;;  %v1859_v36 = vld [vmem:[#allocation7 + $0xa4] ss:$8 sps:$4 sm:$0xff]   ;;  %v1861_v37 = vld [vmem:[#allocation7 + $0xa0] ss:$8 sps:$4 sm:$0xff]  }
  0x8d   : > { %621 = vmatprep.subr.bf16.mxu0 %v1793_v17  ;;  %v382_v17 = vld [vmem:[%s2354_s11 + $0xa8] sm:$0xff]  ;;  %v1864_v39 = vld [vmem:[#allocation7 + $0x90] ss:$8 sps:$4 sm:$0xff]   ;;  %v2428_v54 = vld [vmem:[#allocation8 + $0x14] ss:$8 sps:$4 sm:$0xff]  }
  0x8e   : > { %v2419_v51 = vld [vmem:[#allocation8 + $0x30] ss:$8 sps:$4 sm:$0xff]   ;;  %v2422_v52 = vld [vmem:[#allocation8 + $0x24] ss:$8 sps:$4 sm:$0xff]   ;;  %v2449_v61 = vld [vmem:[#allocation8 + $0xe0] ss:$8 sps:$4 sm:$0xff]  }
  0x8f   : > { %967 = vmatpush1.bf16.msra.mxu1 %v1837_v41  ;;  %v1867_v41 = vld [vmem:[#allocation7 + $0x80] ss:$8 sps:$4 sm:$0xff]   ;;  %v2431_v55 = vld [vmem:[#allocation8 + $0x10] ss:$8 sps:$4 sm:$0xff]   ;;  %v2452_v62 = vld [vmem:[#allocation8 + $0xd4] ss:$8 sps:$4 sm:$0xff]  }
  0x90   : > { %622 = vmatpush1.bf16.msra.mxu0 %v1795_v18  ;;  %968 = vmatprep.subr.bf16.mxu1 %v1838_v43  ;;  %v384_v18 = vld [vmem:[%s2354_s11 + $0xb8] sm:$0xff]  ;;  %v2458_v0 = vld [vmem:[#allocation8 + $0xc4] ss:$8 sps:$4 sm:$0xff]  }
  0x91   : > { %623 = vmatprep.subr.bf16.mxu0 %v1796_v19  ;;  %v397_v19 = vpack.c.bf16 %v379_v16, %v377_v15  ;;  %v1870_v43 = vld [vmem:[#allocation8 + $0x74] ss:$8 sps:$4 sm:$0xff]   ;;  %v2455_v63 = vld [vmem:[#allocation8 + $0xd0] ss:$8 sps:$4 sm:$0xff]  }
  0x92   : > { %v2464_v3 = vld [vmem:[#allocation8 + $0xb4] ss:$8 sps:$4 sm:$0xff]   ;;  %v2467_v5 = vld [vmem:[#allocation8 + $0xb0] ss:$8 sps:$4 sm:$0xff]  }
  0x93   : > { %969 = vmatpush1.bf16.msra.mxu1 %v1840_v45  ;;  %v2401_v45 = vld [vmem:[#allocation8 + $0x60] ss:$8 sps:$4 sm:$0xff]  }
  0x94   : > { %624 = vmatpush2.bf16.msra.mxu0 %v1798_v20  ;;  %970 = vmatprep.subr.bf16.mxu1 %v1841_v47  ;;  %v400_v20 = vpack.c.bf16 %v384_v18, %v382_v17  ;;  %v2407_v47 = vld [vmem:[#allocation8 + $0x50] ss:$8 sps:$4 sm:$0xff]  }
  0x95   : > { %625 = vmatprep.subr.bf16.mxu0 %v1799_v21  ;;  %v381_v21 = vld [vmem:[%s2354_s11 + $0xa0] sm:$0xff] }
  0x96   : > { %v399_v25 = vpack.c.bf16 %v383_v22, %v381_v21 }
  0x97   : > { %971 = vmatpush1.bf16.msra.mxu1 %v1843_v49  ;;  %v2413_v49 = vld [vmem:[#allocation8 + $0x40] ss:$8 sps:$4 sm:$0xff]  }
  0x98   : > { %626 = vmatpush2.bf16.msra.mxu0 %v1801_v26  ;;  %972 = vmatprep.subr.bf16.mxu1 %v1844_v53  ;;  %v402_v26 = vpack.c.bf16 %v388_v24, %v386_v23  ;;  %v2425_v53 = vld [vmem:[#allocation8 + $0x20] ss:$8 sps:$4 sm:$0xff]  }
  0x99   : > { %627 = vmatprep.subr.bf16.mxu0 %v1802_v28  ;;  %v387_v28 = vld [vmem:[%s2354_s11 + $0xd0] sm:$0xff] }
  0x9a   : > { %v401_v29 = vpack.c.bf16 %v387_v28, %v385_v27 }
  0x9b   : > { %973 = vmatpush2.bf16.msra.mxu1 %v1846_v57  ;;  %v2437_v57 = vld [vmem:[#allocation8] ss:$8 sps:$4 sm:$0xff]  }
  0x9c   : > { %628 = vmatpush2.bf16.msra.mxu0 %v1804_v30  ;;  %974 = vmatprep.subr.bf16.mxu1 %v1847_v59  ;;  %v1850_v30 = vld [vmem:[#allocation7 + $0xd4] ss:$8 sps:$4 sm:$0xff]   ;;  %v2443_v59 = vld [vmem:[#allocation8 + $0xf0] ss:$8 sps:$4 sm:$0xff]  }
  0x9d   : > { %629 = vmatprep.subr.bf16.mxu0 %v1805_v32  ;;  %v1853_v32 = vld [vmem:[#allocation7 + $0xc4] ss:$8 sps:$4 sm:$0xff]  }
  0x9f   : > { %975 = vmatpush2.bf16.msra.mxu1 %v1849_v60  ;;  %v2446_v60 = vld [vmem:[#allocation8 + $0xe4] ss:$8 sps:$4 sm:$0xff]  }
  0xa0   : > { %630 = vmatpush2.bf16.msra.mxu0 %v1807_v33  ;;  %976 = vmatprep.subr.bf16.mxu1 %v1850_v30  ;;  %v1855_v33 = vld [vmem:[#allocation7 + $0xc0] ss:$8 sps:$4 sm:$0xff]  }
  0xa1   : > { %631 = vmatprep.subr.bf16.mxu0 %v1808_v35  ;;  %v1858_v35 = vld [vmem:[#allocation7 + $0xb0] ss:$8 sps:$4 sm:$0xff]  }
  0xa3   : > { %977 = vmatpush2.bf16.msra.mxu1 %v1852_v31 }
  0xa4   : > { %632 = vmatpush2.bf16.msra.mxu0 %v1810_v38  ;;  %978 = vmatprep.subr.bf16.mxu1 %v1853_v32  ;;  %v1862_v38 = vld [vmem:[#allocation7 + $0x94] ss:$8 sps:$4 sm:$0xff]  }
  0xa5   : > { %633 = vmatprep.subr.bf16.mxu0 %v1811_v40  ;;  %v1865_v40 = vld [vmem:[#allocation7 + $0x84] ss:$8 sps:$4 sm:$0xff]  }
  0xa7   : > { %979 = vmatpush2.bf16.msra.mxu1 %v1855_v33 }
  0xa8   : > { %634 = vmatpush2.bf16.msra.mxu0 %v1813_v42  ;;  %980 = vmatprep.subr.bf16.mxu1 %v1856_v34  ;;  %v2396_v42 = vld [vmem:[#allocation8 + $0x70] ss:$8 sps:$4 sm:$0xff]  }
  0xa9   : > { %635 = vmatprep.subr.bf16.mxu0 %v1814_v44  ;;  %v2398_v44 = vld [vmem:[#allocation8 + $0x64] ss:$8 sps:$4 sm:$0xff]  }
  0xab   : > { %981 = vmatpush2.bf16.msra.mxu1 %v1858_v35 }
  0xac   : > { %636 = vmatpush2.bf16.msra.mxu0 %v1816_v46  ;;  %982 = vmatprep.subr.bf16.mxu1 %v1859_v36  ;;  %v2404_v46 = vld [vmem:[#allocation8 + $0x54] ss:$8 sps:$4 sm:$0xff]  }
  0xad   : > { %637 = vmatprep.subr.bf16.mxu0 %v1817_v48  ;;  %v2410_v48 = vld [vmem:[#allocation8 + $0x44] ss:$8 sps:$4 sm:$0xff]  }
  0xaf   : > { %983 = vmatpush2.bf16.msra.mxu1 %v1861_v37 }
  0xb0   : > { %638 = vmatpush2.bf16.msra.mxu0 %v1819_v50  ;;  %984 = vmatprep.subr.bf16.mxu1 %v1862_v38  ;;  %v2416_v50 = vld [vmem:[#allocation8 + $0x34] ss:$8 sps:$4 sm:$0xff]  }
  0xb1   : > { %1277 = vmatprep.subr.bf16.mxu0 %v1870_v43 }
  0xb3   : > { %640 = vmatmul.mubr.bf16.vlgmr.msra.gmra.mxu0 %v389_v56  ;;  %985 = vmatpush2.bf16.msra.mxu1 %v1864_v39  ;;  %v2434_v56 = vld [vmem:[#allocation8 + $0x4] ss:$8 sps:$4 sm:$0xff]  }
  0xb4   : > { %649 = vmatprep.mubr.bf16.mxu0 %v392_v58  ;;  %986 = vmatprep.subr.bf16.mxu1 %v1865_v40  ;;  %v2440_v58 = vld [vmem:[#allocation8 + $0xf4] ss:$8 sps:$4 sm:$0xff]  }
  0xb5   : > { %1278 = vmatpush1.bf16.msra.mxu0 %v2396_v42 }
  0xb6   : > { %1279 = vmatprep.subr.bf16.mxu0 %v2398_v44 }
  0xb7   : > { %987 = vmatpush2.bf16.msra.mxu1 %v1867_v41 }
  0xb8   : > { %1662 = vmatprep.subr.bf16.mxu1 %v1870_v43 }
  0xb9   : > { %1280 = vmatpush1.bf16.msra.mxu0 %v2401_v45 }
  0xba   : > { %1281 = vmatprep.subr.bf16.mxu0 %v2404_v46 }
  0xbb   : > { %650 = vmatmul.mubr.bf16.gmra.mxu0 %v391_v1  ;;  %v437_v1 = vlaneseq }
  0xbc   : > { %659 = vmatprep.mubr.bf16.mxu0 %v394_v2  ;;  %v2461_v2 = vld [vmem:[#allocation8 + $0xc0] ss:$8 sps:$4 sm:$0xff]  }
  0xbd   : > { %1282 = vmatpush1.bf16.msra.mxu0 %v2407_v47  ;;  %v438_v4 = vshrl.u32 %v437_v1, 7 }
  0xbe   : > { %1283 = vmatprep.subr.bf16.mxu0 %v2410_v48 }
  0xbf   : > { %v2470_v6 = vsub.s32 1, %v438_v4 }
  0xc1   : > { %1284 = vmatpush1.bf16.msra.mxu0 %v2413_v49 }
  0xc2   : > { %1285 = vmatprep.subr.bf16.mxu0 %v2416_v50 }
  0xc3   : > { %660 = vmatmul.mubr.bf16.gmra.mxu0 %v393_v7  ;;  %v435_v7 = vld [vmem:[%s2707_s2] sm:$0x3] }
  0xc4   : > { %669 = vmatprep.mubr.bf16.mxu0 %v396_v8  ;;  %v2476_v8 = vsub.s32 0, %v438_v4  ;;  %v2479_v9 = vrot.slane %v435_v7, %v2470_v6 }
  0xc5   : > { %1286 = vmatpush1.bf16.msra.mxu0 %v2419_v51 }
  0xc6   : > { %1287 = vmatprep.subr.bf16.mxu0 %v2422_v52  ;;  %v2482_v11 = vrot.slane %v435_v7, %v2476_v8 }
  0xc9   : > { %1288 = vmatpush1.bf16.msra.mxu0 %v2425_v53 }
  0xca   : > { %1289 = vmatprep.subr.bf16.mxu0 %v2428_v54 }
  0xcb   : > { %670 = vmatmul.mubr.bf16.gmra.mxu0 %v395_v13 }
  0xcc   : > { %679 = vmatprep.mubr.bf16.mxu0 %v398_v14 }
  0xcd   : > { %1290 = vmatpush1.bf16.msra.mxu0 %v2431_v55 }
  0xce   : > { %1291 = vmatprep.subr.bf16.mxu0 %v2434_v56 }
  0xd1   : > { %1292 = vmatpush1.bf16.msra.mxu0 %v2437_v57 }
  0xd2   : > { %1293 = vmatprep.subr.bf16.mxu0 %v2440_v58 }
  0xd3   : > { %680 = vmatmul.mubr.bf16.gmra.mxu0 %v397_v19 }
  0xd4   : > { %689 = vmatprep.mubr.bf16.mxu0 %v400_v20 }
  0xd5   : > { %1294 = vmatpush2.bf16.msra.mxu0 %v2443_v59 }
  0xd6   : > { %1295 = vmatprep.subr.bf16.mxu0 %v2446_v60 }
  0xd9   : > { %1296 = vmatpush2.bf16.msra.mxu0 %v2449_v61 }
  0xda   : > { %1297 = vmatprep.subr.bf16.mxu0 %v2452_v62 }
  0xdb   : > { %690 = vmatmul.mubr.bf16.gmra.mxu0 %v399_v25 }
  0xdc   : > { %699 = vmatprep.mubr.bf16.mxu0 %v402_v26 }
  0xdd   : > { %1298 = vmatpush2.bf16.msra.mxu0 %v2455_v63 }
  0xde   : > { %1299 = vmatprep.subr.bf16.mxu0 %v2458_v0 }
  0xe1   : > { %1300 = vmatpush2.bf16.msra.mxu0 %v2461_v2 }
  0xe2   : > { %1301 = vmatprep.subr.bf16.mxu0 %v2464_v3 }
  0xe3   : > { %700 = vmatmul.mubr.bf16.gmra.mxu0 %v401_v29 }
  0xe5   : > { %1302 = vmatpush2.bf16.msra.mxu0 %v2467_v5 }
 0x173   : > { %v641_v10 = vpop.f32.mrf.mxu0 }
 0x174   : > { %v642_v16 = vadd.f32 %v641_v10, %v2482_v11 }
 0x175   : > { %v643_v12 = vpop.f32.mrf.mxu0 }
 0x176   : > { %v644_v13 = vadd.f32 %v643_v12, %v2479_v9 }
 0x177   : > { %v645_v14 = vpop.f32.mrf.mxu0 }
 0x178   : > { %v646_v15 = vadd.f32 %v645_v14, %v2482_v11  ;;  %1916 = vtanh.f32 %v644_v13 }
 0x179   : > { %v647_v17 = vpop.f32.mrf.mxu0 }
 0x17a   : > { %v648_v18 = vadd.f32 %v647_v17, %v2479_v9  ;;  %1918 = vtanh.f32 %v646_v15 }
 0x17b   : > { %v651_v19 = vpop.f32.mrf.mxu0 }
 0x17c   : > { %1920 = vtanh.f32 %v648_v18  ;;  %v652_v24 = vadd.f32 %v651_v19, %v2482_v11 }
 0x17d   : > { %1922 = vtanh.f32 %v642_v16  ;;  %v653_v20 = vpop.f32.mrf.mxu0 }
 0x17e   : > { %v654_v21 = vadd.f32 %v653_v20, %v2479_v9 }
 0x17f   : > { %v655_v22 = vpop.f32.mrf.mxu0 }
 0x180   : > { %v656_v23 = vadd.f32 %v655_v22, %v2482_v11  ;;  %1924 = vtanh.f32 %v654_v21 }
 0x181   : > { %v657_v25 = vpop.f32.mrf.mxu0 }
 0x182   : > { %v658_v26 = vadd.f32 %v657_v25, %v2479_v9  ;;  %1926 = vtanh.f32 %v656_v23 }
 0x183   : > { %v661_v27 = vpop.f32.mrf.mxu0 }
 0x184   : > { %1928 = vtanh.f32 %v658_v26  ;;  %v662_v35 = vadd.f32 %v661_v27, %v2482_v11 }
 0x185   : > { %1930 = vtanh.f32 %v652_v24  ;;  %v663_v28 = vpop.f32.mrf.mxu0  ;;  %v1917_v30 = vpop.eup %1916 }
 0x186   : > { %v664_v29 = vadd.f32 %v663_v28, %v2479_v9 }
 0x187   : > { %v665_v31 = vpop.f32.mrf.mxu0  ;;  %v1919_v32 = vpop.eup %1918 }
 0x188   : > { %v666_v33 = vadd.f32 %v665_v31, %v2482_v11  ;;  %1932 = vtanh.f32 %v664_v29 }
 0x189   : > { %v1921_v34 = vpop.eup %1920  ;;  %v667_v36 = vpop.f32.mrf.mxu0 }
 0x18a   : > { %v1923_v37 = vpop.eup %1922  ;;  %v668_v38 = vadd.f32 %v667_v36, %v2479_v9  ;;  %v739_v39 = vpack.c.bf16 %v1921_v34, %v1917_v30  ;;  %1934 = vtanh.f32 %v666_v33 }
 0x18b   : > { %v671_v40 = vpop.f32.mrf.mxu0  ;;  %v738_v41 = vpack.c.bf16 %v1919_v32, %v1923_v37 }
 0x18c   : > { %1936 = vtanh.f32 %v668_v38  ;;  %988 = vmatprep.mubr.bf16.mxu1 %v739_v39  ;;  %v672_v14 = vadd.f32 %v671_v40, %v2482_v11 }
 0x18d   : > { %1938 = vtanh.f32 %v662_v35  ;;  %v673_v43 = vpop.f32.mrf.mxu0  ;;  %989 = vmatmul.mubr.bf16.vlgmr.msra.gmra.mxu1 %v738_v41  ;;  %v1925_v4 = vpop.eup %1924 }
 0x18e   : > { %v674_v1 = vadd.f32 %v673_v43, %v2479_v9  ;;  %1678 = vmatpush1.bf16.msra.mxu1 %v2396_v42 }
 0x18f   : > { %v675_v7 = vpop.f32.mrf.mxu0  ;;  %1663 = vmatprep.subr.bf16.mxu1 %v2398_v44  ;;  %v1927_v10 = vpop.eup %1926 }
 0x190   : > { %v676_v12 = vadd.f32 %v675_v7, %v2482_v11  ;;  %1940 = vtanh.f32 %v674_v1 }
 0x191   : > { %v1929_v13 = vpop.eup %1928  ;;  %v677_v15 = vpop.f32.mrf.mxu0 }
 0x192   : > { %v1931_v16 = vpop.eup %1930  ;;  %v678_v17 = vadd.f32 %v677_v15, %v2479_v9  ;;  %v741_v18 = vpack.c.bf16 %v1929_v13, %v1925_v4  ;;  %1679 = vmatpush1.bf16.msra.mxu1 %v2401_v45  ;;  %1942 = vtanh.f32 %v676_v12 }
 0x193   : > { %v681_v42 = vpop.f32.mrf.mxu0  ;;  %v740_v19 = vpack.c.bf16 %v1927_v10, %v1931_v16  ;;  %1664 = vmatprep.subr.bf16.mxu1 %v2404_v46 }
 0x194   : > { %1944 = vtanh.f32 %v678_v17  ;;  %998 = vmatprep.mubr.bf16.mxu1 %v741_v18  ;;  %v682_v25 = vadd.f32 %v681_v42, %v2482_v11  ;;  %v1913_v42 = vld [vmem:[#allocation8 + $0x80] ss:$8 sps:$4 sm:$0xff]  }
 0x195   : > { %1946 = vtanh.f32 %v672_v14  ;;  %v683_v44 = vpop.f32.mrf.mxu0  ;;  %999 = vmatmul.mubr.bf16.gmra.mxu1 %v740_v19  ;;  %v1933_v21 = vpop.eup %1932 }
 0x196   : > { %v684_v20 = vadd.f32 %v683_v44, %v2479_v9  ;;  %1680 = vmatpush1.bf16.msra.mxu1 %v2407_v47 }
 0x197   : > { %v685_v22 = vpop.f32.mrf.mxu0  ;;  %1665 = vmatprep.subr.bf16.mxu1 %v2410_v48  ;;  %v1935_v23 = vpop.eup %1934 }
 0x198   : > { %v686_v45 = vadd.f32 %v685_v22, %v2482_v11  ;;  %1948 = vtanh.f32 %v684_v20 }
 0x199   : > { %v1937_v24 = vpop.eup %1936  ;;  %v687_v46 = vpop.f32.mrf.mxu0 }
 0x19a   : > { %v1939_v26 = vpop.eup %1938  ;;  %v688_v27 = vadd.f32 %v687_v46, %v2479_v9  ;;  %v743_v28 = vpack.c.bf16 %v1937_v24, %v1933_v21  ;;  %1681 = vmatpush1.bf16.msra.mxu1 %v2413_v49  ;;  %1950 = vtanh.f32 %v686_v45 }
 0x19b   : > { %v691_v47 = vpop.f32.mrf.mxu0  ;;  %v742_v29 = vpack.c.bf16 %v1935_v23, %v1939_v26  ;;  %1666 = vmatprep.subr.bf16.mxu1 %v2416_v50 }
 0x19c   : > { %1952 = vtanh.f32 %v688_v27  ;;  %1008 = vmatprep.mubr.bf16.mxu1 %v743_v28  ;;  %v692_v35 = vadd.f32 %v691_v47, %v2482_v11 }
 0x19d   : > { %1954 = vtanh.f32 %v682_v25  ;;  %v693_v48 = vpop.f32.mrf.mxu0  ;;  %1009 = vmatmul.mubr.bf16.gmra.mxu1 %v742_v29  ;;  %v1941_v31 = vpop.eup %1940 }
 0x19e   : > { %v694_v30 = vadd.f32 %v693_v48, %v2479_v9  ;;  %1682 = vmatpush1.bf16.msra.mxu1 %v2419_v51 }
 0x19f   : > { %v695_v32 = vpop.f32.mrf.mxu0  ;;  %1667 = vmatprep.subr.bf16.mxu1 %v2422_v52  ;;  %v1943_v33 = vpop.eup %1942 }
 0x1a0   : > { %v696_v49 = vadd.f32 %v695_v32, %v2482_v11  ;;  %1956 = vtanh.f32 %v694_v30 }
 0x1a1   : > { %v1945_v34 = vpop.eup %1944  ;;  %v697_v50 = vpop.f32.mrf.mxu0 }
 0x1a2   : > { %v1947_v36 = vpop.eup %1946  ;;  %v698_v37 = vadd.f32 %v697_v50, %v2479_v9  ;;  %v745_v38 = vpack.c.bf16 %v1945_v34, %v1941_v31  ;;  %1683 = vmatpush1.bf16.msra.mxu1 %v2425_v53  ;;  %1958 = vtanh.f32 %v696_v49 }
 0x1a3   : > { %v701_v51 = vpop.f32.mrf.mxu0  ;;  %v744_v39 = vpack.c.bf16 %v1943_v33, %v1947_v36  ;;  %1668 = vmatprep.subr.bf16.mxu1 %v2428_v54 }
 0x1a4   : > { %1960 = vtanh.f32 %v698_v37  ;;  %1018 = vmatprep.mubr.bf16.mxu1 %v745_v38  ;;  %v702_v7 = vadd.f32 %v701_v51, %v2482_v11 }
 0x1a5   : > { %1962 = vtanh.f32 %v692_v35  ;;  %v703_v52 = vpop.f32.mrf.mxu0  ;;  %1019 = vmatmul.mubr.bf16.gmra.mxu1 %v744_v39  ;;  %v1949_v41 = vpop.eup %1948 }
 0x1a6   : > { %v704_v40 = vadd.f32 %v703_v52, %v2479_v9  ;;  %1684 = vmatpush1.bf16.msra.mxu1 %v2431_v55 }
 0x1a7   : > { %v705_v43 = vpop.f32.mrf.mxu0  ;;  %1669 = vmatprep.subr.bf16.mxu1 %v2434_v56  ;;  %v1951_v1 = vpop.eup %1950 }
 0x1a8   : > { %v706_v53 = vadd.f32 %v705_v43, %v2482_v11  ;;  %1964 = vtanh.f32 %v704_v40 }
 0x1a9   : > { %v1953_v4 = vpop.eup %1952  ;;  %v707_v54 = vpop.f32.mrf.mxu0 }
 0x1aa   : > { %v1955_v10 = vpop.eup %1954  ;;  %v708_v12 = vadd.f32 %v707_v54, %v2479_v9  ;;  %v747_v13 = vpack.c.bf16 %v1953_v4, %v1949_v41  ;;  %1685 = vmatpush1.bf16.msra.mxu1 %v2437_v57  ;;  %1966 = vtanh.f32 %v706_v53 }
 0x1ab   : > { %v746_v55 = vpack.c.bf16 %v1951_v1, %v1955_v10  ;;  %1670 = vmatprep.subr.bf16.mxu1 %v2440_v58 }
 0x1ac   : > { %1968 = vtanh.f32 %v708_v12  ;;  %1028 = vmatprep.mubr.bf16.mxu1 %v747_v13 }
 0x1ad   : > { %1970 = vtanh.f32 %v702_v7  ;;  %1029 = vmatmul.mubr.bf16.gmra.mxu1 %v746_v55  ;;  %v1957_v56 = vpop.eup %1956 }
 0x1ae   : > { %1686 = vmatpush2.bf16.msra.mxu1 %v2443_v59 }
 0x1af   : > { %1671 = vmatprep.subr.bf16.mxu1 %v2446_v60  ;;  %v1959_v11 = vpop.eup %1958 }
 0x1b1   : > { %v1961_v14 = vpop.eup %1960 }
 0x1b2   : > { %v1963_v15 = vpop.eup %1962  ;;  %v749_v9 = vpack.c.bf16 %v1961_v14, %v1957_v56  ;;  %1687 = vmatpush2.bf16.msra.mxu1 %v2449_v61  ;;  %v1909_v61 = vld [vmem:[#allocation8 + $0xa4] ss:$8 sps:$4 sm:$0xff]  }
 0x1b3   : > { %v748_v57 = vpack.c.bf16 %v1959_v11, %v1963_v15  ;;  %1672 = vmatprep.subr.bf16.mxu1 %v2452_v62  ;;  %v1907_v62 = vld [vmem:[#allocation8 + $0xa0] ss:$8 sps:$4 sm:$0xff]   ;;  %1303 = vmatprep.subr.bf16.mxu0 %v1909_v61 }
 0x1b4   : > { %1038 = vmatprep.mubr.bf16.mxu1 %v749_v9  ;;  %1304 = vmatpush2.bf16.msra.mxu0 %v1907_v62 }
 0x1b5   : > { %1039 = vmatmul.mubr.bf16.gmra.mxu1 %v748_v57  ;;  %v1965_v58 = vpop.eup %1964 }
 0x1b6   : > { %1688 = vmatpush2.bf16.msra.mxu1 %v2455_v63  ;;  %v1912_v63 = vld [vmem:[#allocation8 + $0x94] ss:$8 sps:$4 sm:$0xff]  }
 0x1b7   : > { %1673 = vmatprep.subr.bf16.mxu1 %v2458_v0  ;;  %v1967_v59 = vpop.eup %1966  ;;  %v1910_v0 = vld [vmem:[#allocation8 + $0x90] ss:$8 sps:$4 sm:$0xff]   ;;  %1305 = vmatprep.subr.bf16.mxu0 %v1912_v63 }
 0x1b8   : > { %1306 = vmatpush2.bf16.msra.mxu0 %v1910_v0 }
 0x1b9   : > { %v1969_v16 = vpop.eup %1968 }
 0x1ba   : > { %v1971_v17 = vpop.eup %1970  ;;  %v751_v60 = vpack.c.bf16 %v1969_v16, %v1965_v58  ;;  %1689 = vmatpush2.bf16.msra.mxu1 %v2461_v2  ;;  %v1915_v2 = vld [vmem:[#allocation8 + $0x84] ss:$8 sps:$4 sm:$0xff]  }
 0x1bb   : > { %v750_v18 = vpack.c.bf16 %v1967_v59, %v1971_v17  ;;  %1674 = vmatprep.subr.bf16.mxu1 %v2464_v3  ;;  %1307 = vmatprep.subr.bf16.mxu0 %v1915_v2 }
 0x1bc   : > { %1048 = vmatprep.mubr.bf16.mxu1 %v751_v60  ;;  %1308 = vmatpush2.bf16.msra.mxu0 %v1913_v42 }
 0x1bd   : > { %1049 = vmatmul.mubr.bf16.gmra.mxu1 %v750_v18 }
 0x1be   : > { %1690 = vmatpush2.bf16.msra.mxu1 %v2467_v5  ;;  %v784_v5 = vld [vmem:[%s2709_s4] sm:$0x3] }
 0x1bf   : > { %1675 = vmatprep.subr.bf16.mxu1 %v1909_v61  ;;  %v2541_v44 = vrot.slane %v784_v5, %v2470_v6  ;;  %v2544_v20 = vrot.slane %v784_v5, %v2476_v8 }
 0x1c2   : > { %1691 = vmatpush2.bf16.msra.mxu1 %v1907_v62 }
 0x1c3   : > { %1676 = vmatprep.subr.bf16.mxu1 %v1912_v63 }
 0x1c6   : > { %1692 = vmatpush2.bf16.msra.mxu1 %v1910_v0 }
 0x1c7   : > { %1677 = vmatprep.subr.bf16.mxu1 %v1915_v2 }
 0x1ca   : > { %1693 = vmatpush2.bf16.msra.mxu1 %v1913_v42 }
 0x24d   : > { %v990_v3 = vpop.f32.mrf.mxu1 }
 0x24e   : > { %v991_v25 = vadd.f32 %v990_v3, %v2544_v20 }
 0x24f   : > { %v992_v19 = vpop.f32.mrf.mxu1 }
 0x250   : > { %v993_v45 = vadd.f32 %v992_v19, %v2541_v44 }
 0x251   : > { %v994_v21 = vpop.f32.mrf.mxu1 }
 0x252   : > { %v995_v22 = vadd.f32 %v994_v21, %v2544_v20 }
 0x253   : > { %v996_v23 = vpop.f32.mrf.mxu1 }
 0x254   : > { %v997_v24 = vadd.f32 %v996_v23, %v2541_v44  ;;  %v1059_v27 = vpack.c.bf16 %v995_v22, %v991_v25 }
 0x255   : > { %v1000_v46 = vpop.f32.mrf.mxu1 }
 0x256   : > { %v1060_v26 = vpack.c.bf16 %v997_v24, %v993_v45  ;;  %v1001_v32 = vadd.f32 %v1000_v46, %v2544_v20 }
 0x257   : > { %v1002_v28 = vpop.f32.mrf.mxu1 }
 0x258   : > { %1309 = vmatprep.mubr.bf16.mxu0 %v1060_v26  ;;  %v1003_v30 = vadd.f32 %v1002_v28, %v2541_v44 }
 0x259   : > { %v1004_v47 = vpop.f32.mrf.mxu1  ;;  %1310 = vmatmul.mubr.bf16.vlgmr.msra.gmra.mxu0 %v1059_v27  ;;  %v1105_v27 = vld [vmem:[%s2711_s6] sm:$0x3] }
 0x25a   : > { %v1005_v29 = vadd.f32 %v1004_v47, %v2544_v20  ;;  %v2578_v28 = vrot.slane %v1105_v27, %v2476_v8  ;;  %v2581_v47 = vrot.slane %v1105_v27, %v2470_v6 }
 0x25b   : > { %v1006_v48 = vpop.f32.mrf.mxu1 }
 0x25c   : > { %v1007_v31 = vadd.f32 %v1006_v48, %v2541_v44  ;;  %v1061_v34 = vpack.c.bf16 %v1005_v29, %v1001_v32 }
 0x25d   : > { %v1010_v33 = vpop.f32.mrf.mxu1 }
 0x25e   : > { %v1062_v49 = vpack.c.bf16 %v1007_v31, %v1003_v30  ;;  %v1011_v39 = vadd.f32 %v1010_v33, %v2544_v20 }
 0x25f   : > { %v1012_v35 = vpop.f32.mrf.mxu1 }
 0x260   : > { %1319 = vmatprep.mubr.bf16.mxu0 %v1062_v49  ;;  %v1013_v38 = vadd.f32 %v1012_v35, %v2541_v44 }
 0x261   : > { %v1014_v50 = vpop.f32.mrf.mxu1  ;;  %1320 = vmatmul.mubr.bf16.gmra.mxu0 %v1061_v34 }
 0x262   : > { %v1015_v36 = vadd.f32 %v1014_v50, %v2544_v20 }
 0x263   : > { %v1016_v37 = vpop.f32.mrf.mxu1 }
 0x264   : > { %v1017_v51 = vadd.f32 %v1016_v37, %v2541_v44  ;;  %v1063_v41 = vpack.c.bf16 %v1015_v36, %v1011_v39 }
 0x265   : > { %v1020_v52 = vpop.f32.mrf.mxu1 }
 0x266   : > { %v1064_v40 = vpack.c.bf16 %v1017_v51, %v1013_v38  ;;  %v1021_v10 = vadd.f32 %v1020_v52, %v2544_v20 }
 0x267   : > { %v1022_v43 = vpop.f32.mrf.mxu1 }
 0x268   : > { %1329 = vmatprep.mubr.bf16.mxu0 %v1064_v40  ;;  %v1023_v7 = vadd.f32 %v1022_v43, %v2541_v44 }
 0x269   : > { %v1024_v1 = vpop.f32.mrf.mxu1  ;;  %1330 = vmatmul.mubr.bf16.gmra.mxu0 %v1063_v41 }
 0x26a   : > { %v1025_v53 = vadd.f32 %v1024_v1, %v2544_v20 }
 0x26b   : > { %v1026_v4 = vpop.f32.mrf.mxu1 }
 0x26c   : > { %v1027_v54 = vadd.f32 %v1026_v4, %v2541_v44  ;;  %v1065_v55 = vpack.c.bf16 %v1025_v53, %v1021_v10 }
 0x26d   : > { %v1030_v12 = vpop.f32.mrf.mxu1 }
 0x26e   : > { %v1066_v13 = vpack.c.bf16 %v1027_v54, %v1023_v7  ;;  %v1031_v58 = vadd.f32 %v1030_v12, %v2544_v20 }
 0x26f   : > { %v1032_v56 = vpop.f32.mrf.mxu1 }
 0x270   : > { %1339 = vmatprep.mubr.bf16.mxu0 %v1066_v13  ;;  %v1033_v9 = vadd.f32 %v1032_v56, %v2541_v44 }
 0x271   : > { %v1034_v11 = vpop.f32.mrf.mxu1  ;;  %1340 = vmatmul.mubr.bf16.gmra.mxu0 %v1065_v55 }
 0x272   : > { %v1035_v14 = vadd.f32 %v1034_v11, %v2544_v20 }
 0x273   : > { %v1036_v15 = vpop.f32.mrf.mxu1 }
 0x274   : > { %v1037_v57 = vadd.f32 %v1036_v15, %v2541_v44  ;;  %v1067_v17 = vpack.c.bf16 %v1035_v14, %v1031_v58 }
 0x275   : > { %v1040_v59 = vpop.f32.mrf.mxu1 }
 0x276   : > { %v1068_v16 = vpack.c.bf16 %v1037_v57, %v1033_v9  ;;  %v1041_v2 = vadd.f32 %v1040_v59, %v2544_v20 }
 0x277   : > { %v1042_v60 = vpop.f32.mrf.mxu1 }
 0x278   : > { %1349 = vmatprep.mubr.bf16.mxu1 %v1068_v16  ;;  %v1043_v63 = vadd.f32 %v1042_v60, %v2541_v44 }
 0x279   : > { %v1044_v18 = vpop.f32.mrf.mxu1  ;;  %1350 = vmatmul.mubr.bf16.vlgmr.msra.gmra.mxu1 %v1067_v17 }
 0x27a   : > { %v1045_v61 = vadd.f32 %v1044_v18, %v2544_v20 }
 0x27b   : > { %v1046_v62 = vpop.f32.mrf.mxu1 }
 0x27c   : > { %v1047_v0 = vadd.f32 %v1046_v62, %v2541_v44  ;;  %v1069_v5 = vpack.c.bf16 %v1045_v61, %v1041_v2 }
 0x27d   : > { %v1050_v42 = vpop.f32.mrf.mxu1 }
 0x27e   : > { %v1070_v3 = vpack.c.bf16 %v1047_v0, %v1043_v63  ;;  %v1051_v25 = vadd.f32 %v1050_v42, %v2544_v20 }
 0x27f   : > { %v1052_v19 = vpop.f32.mrf.mxu1 }
 0x280   : > { %1359 = vmatprep.mubr.bf16.mxu1 %v1070_v3  ;;  %v1053_v45 = vadd.f32 %v1052_v19, %v2541_v44 }
 0x281   : > { %v1054_v21 = vpop.f32.mrf.mxu1  ;;  %1360 = vmatmul.mubr.bf16.gmra.mxu1 %v1069_v5 }
 0x282   : > { %v1055_v22 = vadd.f32 %v1054_v21, %v2544_v20 }
 0x283   : > { %v1056_v23 = vpop.f32.mrf.mxu1 }
 0x284   : > { %v1057_v24 = vadd.f32 %v1056_v23, %v2541_v44  ;;  %v1071_v26 = vpack.c.bf16 %v1055_v22, %v1051_v25 }
 0x286   : > { %v1072_v46 = vpack.c.bf16 %v1057_v24, %v1053_v45 }
 0x288   : > { %1369 = vmatprep.mubr.bf16.mxu1 %v1072_v46 }
 0x289   : > { %1370 = vmatmul.mubr.bf16.gmra.mxu1 %v1071_v26 }
 0x319   : > { %v1311_v29 = vpop.f32.mrf.mxu0 }
 0x31a   : > { %v1312_v48 = vadd.f32 %v1311_v29, %v2578_v28 }
 0x31b   : > { %v1313_v44 = vpop.f32.mrf.mxu0 }
 0x31c   : > { %1380 = vst [vmem:[%s2586_s8] sm:$0xff] %v1312_v48  ;;  %v1314_v8 = vadd.f32 %v1313_v44, %v2581_v47 }
 0x31d   : > { %v1315_v20 = vpop.f32.mrf.mxu0 }
 0x31e   : > { %1381 = vst [vmem:[%s2586_s8 + $0x8] sm:$0xff] %v1314_v8  ;;  %v1316_v6 = vadd.f32 %v1315_v20, %v2578_v28 }
 0x31f   : > { %v1317_v30 = vpop.f32.mrf.mxu0 }
 0x320   : > { %1382 = vst [vmem:[%s2586_s8 + $0x10] sm:$0xff] %v1316_v6  ;;  %v1318_v31 = vadd.f32 %v1317_v30, %v2581_v47 }
 0x321   : > { %v1321_v32 = vpop.f32.mrf.mxu0 }
 0x322   : > { %1383 = vst [vmem:[%s2586_s8 + $0x18] sm:$0xff] %v1318_v31  ;;  %v1322_v33 = vadd.f32 %v1321_v32, %v2578_v28 }
 0x323   : > { %v1323_v49 = vpop.f32.mrf.mxu0 }
 0x324   : > { %1384 = vst [vmem:[%s2586_s8 + $0x20] sm:$0xff] %v1322_v33  ;;  %v1324_v34 = vadd.f32 %v1323_v49, %v2581_v47 }
 0x325   : > { %v1325_v35 = vpop.f32.mrf.mxu0 }
 0x326   : > { %1385 = vst [vmem:[%s2586_s8 + $0x28] sm:$0xff] %v1324_v34  ;;  %v1326_v50 = vadd.f32 %v1325_v35, %v2578_v28 }
 0x327   : > { %v1327_v36 = vpop.f32.mrf.mxu0 }
 0x328   : > { %1386 = vst [vmem:[%s2586_s8 + $0x30] sm:$0xff] %v1326_v50  ;;  %v1328_v37 = vadd.f32 %v1327_v36, %v2581_v47 }
 0x329   : > { %v1331_v38 = vpop.f32.mrf.mxu0 }
 0x32a   : > { %1387 = vst [vmem:[%s2586_s8 + $0x38] sm:$0xff] %v1328_v37  ;;  %v1332_v51 = vadd.f32 %v1331_v38, %v2578_v28 }
 0x32b   : > { %v1333_v39 = vpop.f32.mrf.mxu0 }
 0x32c   : > { %1388 = vst [vmem:[%s2586_s8 + $0x40] sm:$0xff] %v1332_v51  ;;  %v1334_v52 = vadd.f32 %v1333_v39, %v2581_v47 }
 0x32d   : > { %v1335_v40 = vpop.f32.mrf.mxu0 }
 0x32e   : > { %1389 = vst [vmem:[%s2586_s8 + $0x48] sm:$0xff] %v1334_v52  ;;  %v1336_v41 = vadd.f32 %v1335_v40, %v2578_v28 }
 0x32f   : > { %v1337_v43 = vpop.f32.mrf.mxu0 }
 0x330   : > { %1390 = vst [vmem:[%s2586_s8 + $0x50] sm:$0xff] %v1336_v41  ;;  %v1338_v1 = vadd.f32 %v1337_v43, %v2581_v47 }
 0x331   : > { %v1341_v53 = vpop.f32.mrf.mxu0 }
 0x332   : > { %1391 = vst [vmem:[%s2586_s8 + $0x58] sm:$0xff] %v1338_v1  ;;  %v1342_v4 = vadd.f32 %v1341_v53, %v2578_v28 }
 0x333   : > { %v1343_v7 = vpop.f32.mrf.mxu0 }
 0x334   : > { %1392 = vst [vmem:[%s2586_s8 + $0x60] sm:$0xff] %v1342_v4  ;;  %v1344_v54 = vadd.f32 %v1343_v7, %v2581_v47 }
 0x335   : > { %v1345_v10 = vpop.f32.mrf.mxu0 }
 0x336   : > { %1393 = vst [vmem:[%s2586_s8 + $0x68] sm:$0xff] %v1344_v54  ;;  %v1346_v12 = vadd.f32 %v1345_v10, %v2578_v28 }
 0x337   : > { %v1347_v13 = vpop.f32.mrf.mxu0 }
 0x338   : > { %1394 = vst [vmem:[%s2586_s8 + $0x70] sm:$0xff] %v1346_v12  ;;  %v1348_v55 = vadd.f32 %v1347_v13, %v2581_v47 }
 0x339   : > { %v1351_v56 = vpop.f32.mrf.mxu1 }
 0x33a   : > { %1395 = vst [vmem:[%s2586_s8 + $0x78] sm:$0xff] %v1348_v55  ;;  %v1352_v11 = vadd.f32 %v1351_v56, %v2578_v28 }
 0x33b   : > { %v1353_v14 = vpop.f32.mrf.mxu1 }
 0x33c   : > { %1396 = vst [vmem:[%s2586_s8 + $0x80] sm:$0xff] %v1352_v11  ;;  %v1354_v15 = vadd.f32 %v1353_v14, %v2581_v47 }
 0x33d   : > { %v1355_v9 = vpop.f32.mrf.mxu1 }
 0x33e   : > { %1397 = vst [vmem:[%s2586_s8 + $0x88] sm:$0xff] %v1354_v15  ;;  %v1356_v57 = vadd.f32 %v1355_v9, %v2578_v28 }
 0x33f   : > { %v1357_v58 = vpop.f32.mrf.mxu1 }
 0x340   : > { %1398 = vst [vmem:[%s2586_s8 + $0x90] sm:$0xff] %v1356_v57  ;;  %v1358_v59 = vadd.f32 %v1357_v58, %v2581_v47 }
 0x341   : > { %v1361_v16 = vpop.f32.mrf.mxu1 }
 0x342   : > { %1399 = vst [vmem:[%s2586_s8 + $0x98] sm:$0xff] %v1358_v59  ;;  %v1362_v17 = vadd.f32 %v1361_v16, %v2578_v28 }
 0x343   : > { %v1363_v60 = vpop.f32.mrf.mxu1 }
 0x344   : > { %1400 = vst [vmem:[%s2586_s8 + $0xa0] sm:$0xff] %v1362_v17  ;;  %v1364_v18 = vadd.f32 %v1363_v60, %v2581_v47 }
 0x345   : > { %v1365_v61 = vpop.f32.mrf.mxu1 }
 0x346   : > { %1401 = vst [vmem:[%s2586_s8 + $0xa8] sm:$0xff] %v1364_v18  ;;  %v1366_v62 = vadd.f32 %v1365_v61, %v2578_v28 }
 0x347   : > { %v1367_v63 = vpop.f32.mrf.mxu1 }
 0x348   : > { %1402 = vst [vmem:[%s2586_s8 + $0xb0] sm:$0xff] %v1366_v62  ;;  %v1368_v0 = vadd.f32 %v1367_v63, %v2581_v47 }
 0x349   : > { %v1371_v2 = vpop.f32.mrf.mxu1 }
 0x34a   : > { %1403 = vst [vmem:[%s2586_s8 + $0xb8] sm:$0xff] %v1368_v0  ;;  %v1372_v42 = vadd.f32 %v1371_v2, %v2578_v28 }
 0x34b   : > { %v1373_v3 = vpop.f32.mrf.mxu1 }
 0x34c   : > { %1404 = vst [vmem:[%s2586_s8 + $0xc0] sm:$0xff] %v1372_v42  ;;  %v1374_v5 = vadd.f32 %v1373_v3, %v2581_v47 }
 0x34d   : > { %v1375_v19 = vpop.f32.mrf.mxu1 }
 0x34e   : > { %1405 = vst [vmem:[%s2586_s8 + $0xc8] sm:$0xff] %v1374_v5  ;;  %v1376_v21 = vadd.f32 %v1375_v19, %v2578_v28  ;;  %1415 = sbr.rel (!%p2728_p1) target bundleno = 878 (0x36e), region = 68 }
 0x34f   : > { %v1377_v22 = vpop.f32.mrf.mxu1 }
 0x350   : > { %1406 = vst [vmem:[%s2586_s8 + $0xd0] sm:$0xff] %v1376_v21  ;;  %v1378_v23 = vadd.f32 %v1377_v22, %v2581_v47 }
 0x352   : > { %1407 = vst [vmem:[%s2586_s8 + $0xd8] sm:$0xff] %v1378_v23 }
 0x353   : > { %s2737_s1 = smov (!%p1418_p6, %s1417_s1), 14 }
 0x354   : > { %s2647_s20 = sshll.u32 %s2737_s1, 8 }
 0x355   : > { %s1423_s22 = ssub.s32 3584, %s2647_s20 }
 0x356   : > { %1424 = vsyncadd %s1409_s9, %s1423_s22  ;;  %p1647_p11 = scmp.ne.s32.totalorder %s2647_s20, 0  ;;  %s1661_s13 = smul.u32 3584, %s2222_s28 }
 0x357   : > { %s1430_s17 = sshll.u32 %s2586_s8, 4  ;;  %s2158_s23 = smov [#allocation10]   ;;  %s2660_s17 = int_to_ptr.vmem [resolvable:$true] %s1430_s17 }
 0x358   : > { %s2658_s15 = scalar_lea.hbm %s2712_s7, %s1661_s13  ;;  %s2076_s18 = scalar_lea.vmem %s2660_s17, %s2647_s20 }
 0x359   : > { %p2077_p3 = scmp.ne.s32.totalorder %s2660_s17, %s2076_s18  ;;  %s2080_s29 = sshll.u32 %s2158_s23, 4  ;;  %s2081_s29 = int_to_ptr.vmem [resolvable:$false] %s2080_s29 }
 0x35a   : > { %s2082_s28 = scalar_lea.vmem %s2081_s29, 7168  ;;  %p2083_p9 = scmp.lt.s32.totalorder %s2660_s17, %s2081_s29 }
 0x35b   : > { %p2078_p0 = pnand %p2077_p3, %p1647_p11  ;;  %p2084_p8 = scmp.lt.s32.totalorder %s2082_s28, %s2076_s18 }
 0x35d   : > { %p2079_p2 = pneg %p2078_p0  ;;  %p2085_p12 = por %p2084_p8, %p2083_p9 }
 0x35f   : > { %p2086_p5 = pnand %p2085_p12, %p2079_p2 }
 0x361   : > { %2089 = shalt.err (!%p2086_p5)
}
 0x362   : > { %s2090_s16 = scalar_lea.hbm %s2658_s15, %s2647_s20  ;;  %s2094_s1 = scalar_lea.hbm %s2712_s7, 6400 }
 0x363   : > { %p2091_p13 = scmp.ne.s32.totalorder %s2658_s15, %s2090_s16  ;;  %p2095_p1 = scmp.lt.s32.totalorder %s2658_s15, %s2712_s7 }
 0x364   : > { %p2096_p6 = scmp.lt.s32.totalorder %s2094_s1, %s2090_s16 }
 0x365   : > { %p2092_p4 = pnand %p2091_p13, %p1647_p11 }
 0x366   : > { %p2097_p3 = por %p2096_p6, %p2095_p1 }
 0x367   : > { %p2093_p10 = pneg %p2092_p4 }
 0x369   : > { %p2098_p0 = pnand %p2097_p3, %p2093_p10 }
 0x36b   : > { %2101 = shalt.err (!%p2098_p0)
}
 0x36c   : > { %s2159_s11 = smov 256   ;;  %s2160_s12 = smov 16  }
 0x36d   : > { %1436 = dma.vmem_to_hbm [thread:$0]  (%p1647_p11), %s2660_s17, %s2647_s20, %s2658_s15, %s1409_s9, %s2159_s11, %s2159_s11, %s2160_s12  }
 0x36e PF: > { %s1445_s18 = sand.u32 1, %s2136_s24   ;;  %p2729_p2 = scmp.ne.s32.totalorder %s2719_s14, 0 }
 0x36f   : > { %s1446_s23 = scalar_lea.sflag [#allocation4], %s1445_s18 }
 0x370   : > { %p1721_p9 = pnand %p1537_p7, %p2729_p2 }
 0x372   : > { %p1722_p8 = pneg %p1721_p9 }
 0x374   : > { %2131 = dma.done.wait (%p1722_p8), %s1446_s23, 3584  }
 0x375   : > { %2133 = vsyncadd (%p1722_p8), %s1446_s23, 4294963712  ;;  %p22_p12 = scmp.ge.s32.totalorder %s2226_s30, 4   ;;  %s2730_s24 = smov %s2140_s25 }
 0x376   : > { %s2731_s25 = smov %s2144_s26  ;;  %s2732_s26 = smov %s2238_s10 }
 0x377   : > { %s2733_s27 = smov %s2226_s30  ;;  %24 = sbr.rel (!%p22_p12) target bundleno = 9 (0x9), region = 105 }
 0x37c   :  { %1451 = vsyncpa [#allocation3], 1 }
 0x37d   :  { %1453 = vsyncpa [#allocation3 + $0x1], 1 }
 0x37e   :  { %1454 = vsyncpa [#allocation6], 1 }
 0x37f   :  { %1455 = vsyncpa [#allocation9], 1 }
 0x380   :  { %1456 = vsyncpa [#allocation4], 1 }
 0x381   :  { %1458 = vsyncpa [#allocation4 + $0x1], 1 }

</bundles_post_ra>
